<compile_context>
chip_gen: v5e
topology: v5e:2x2
jax: 0.10.0
libtpu: 0.0.40
codegen_flags: <defaults>
</compile_context>

<pallas_src>
import math

import jax
import jax.numpy as jnp
from jax.experimental import pallas as pl
from jax.experimental.pallas import tpu as pltpu


def _linear_kernel(x_ref, w_ref, b_ref, o_ref):
    # x_ref: (TM, K)   one row-tile of the input
    # w_ref: (K, N)    full weight, already transposed, resident in VMEM
    # b_ref: (1, N)    full bias, resident in VMEM
    # o_ref: (TM, N)   one row-tile of the output
    acc = jax.lax.dot_general(
        x_ref[...],
        w_ref[...],
        dimension_numbers=(((1,), (0,)), ((), ())),   # (TM,K) x (K,N) -> (TM,N)
        preferred_element_type=jnp.float32,
    )
    o_ref[...] = (acc + b_ref[...].astype(jnp.float32)).astype(o_ref.dtype)


def _round_up(x, m):
    return ((x + m - 1) // m) * m


def _choose_tm(M, K, N, x_item, out_item, sub, vmem_budget, w_bytes, b_bytes,
               target_step_bytes):
    """Pick the row-tile size from per-step HBM bytes and a VMEM budget."""
    per_row = K * x_item + N * out_item
    # Target >= ~2 MiB streamed per grid step (amortizes ~0.35 us/step overhead).
    tm = max(sub, target_step_bytes // max(per_row, 1))
    # VMEM cap: resident weight/bias (charged 2x) + double-buffered x/out tiles.
    avail = vmem_budget - 2 * (w_bytes + b_bytes) - (2 << 20)  # 2 MiB slack
    if avail > 0:
        tm = min(tm, max(sub, avail // (2 * per_row)))
    # Never larger than the (sublane-rounded) problem size.
    tm = min(tm, _round_up(M, sub))
    # Keep >= 4 grid steps when M permits so v7x's two TensorCores both work.
    if M >= 4 * sub:
        tm = min(tm, _round_up(-(-M // 4), sub))
    return max(sub, (tm // sub) * sub)


def linear_embedding_sp(x, weight, bias, *, target_step_bytes=2 << 20,
                        vmem_budget=48 << 20):
    """Forward of LinearEmbedding_sp: y = x @ weight.T + bias.

    x:      (..., inp_size)
    weight: (d_model, inp_size)   (PyTorch nn.Linear convention)
    bias:   (d_model,)
    """
    inp_size = x.shape[-1]
    d_model = weight.shape[0]
    lead_shape = x.shape[:-1]
    M = math.prod(lead_shape) if lead_shape else 1

    x2d = x.reshape(M, inp_size)
    w_t = weight.T                     # (K, N): one-time transpose, MXU-friendly
    b2d = bias.reshape(1, d_model)

    out_dtype = x.dtype
    x_item = jnp.dtype(x.dtype).itemsize
    w_item = jnp.dtype(weight.dtype).itemsize
    b_item = jnp.dtype(bias.dtype).itemsize
    out_item = jnp.dtype(out_dtype).itemsize

    # Sublane multiple depends on dtype packing: 8 (f32) / 16 (bf16) / 32 (int8/fp8).
    sub = {4: 8, 2: 16, 1: 32}.get(x_item, 8)

    w_bytes = inp_size * d_model * w_item
    b_bytes = d_model * b_item

    TM = _choose_tm(M, inp_size, d_model, x_item, out_item, sub,
                    vmem_budget, w_bytes, b_bytes, target_step_bytes)

    grid = (pl.cdiv(M, TM),)

    # Explicit VMEM limit from the actual footprint (>= 32 MiB floor).
    vmem_needed = (2 * (w_bytes + b_bytes)
                   + 2 * TM * inp_size * x_item
                   + 2 * TM * d_model * out_item
                   + (2 << 20))
    vmem_limit = max(vmem_needed, 32 << 20)

    cost = pl.CostEstimate(
        flops=2 * M * inp_size * d_model,
        transcendentals=0,
        bytes_accessed=(M * inp_size * x_item
                        + inp_size * d_model * w_item
                        + d_model * b_item
                        + M * d_model * out_item),
    )

    out2d = pl.pallas_call(
        _linear_kernel,
        out_shape=jax.ShapeDtypeStruct((M, d_model), out_dtype),
        grid=grid,
        in_specs=[
            pl.BlockSpec((TM, inp_size), lambda i: (i, 0)),        # x: tiled rows
            pl.BlockSpec((inp_size, d_model), lambda i: (0, 0)),   # W^T: resident
            pl.BlockSpec((1, d_model), lambda i: (0, 0)),          # b: resident
        ],
        out_specs=pl.BlockSpec((TM, d_model), lambda i: (i, 0)),
        compiler_params=pltpu.CompilerParams(
            dimension_semantics=("parallel",),
            vmem_limit_bytes=vmem_limit,
        ),
        cost_estimate=cost,
    )(x2d, w_t, b2d)

    return out2d.reshape(*lead_shape, d_model)


if __name__ == "__main__":
    # Small shapes consistent with the module's forward pass.
    inp_size = 4
    d_model = 32
    batch, seq = 2, 8

    key = jax.random.PRNGKey(0)
    kx, kw, kb = jax.random.split(key, 3)

    # Deterministic init mimicking PyTorch Linear default U(-1/sqrt(K), 1/sqrt(K)).
    bound = 1.0 / (inp_size ** 0.5)
    weight = jax.random.uniform(kw, (d_model, inp_size), jnp.float32, -bound, bound)
    bias = jax.random.uniform(kb, (d_model,), jnp.float32, -bound, bound)

    x = jax.random.normal(kx, (batch, seq, inp_size), jnp.float32)

    out = linear_embedding_sp(x, weight, bias)
    jax.block_until_ready(out)

    # Reference check in plain JAX.
    ref = x @ weight.T + bias
    assert out.shape == (batch, seq, d_model)
    assert jnp.allclose(out, ref, atol=1e-5, rtol=1e-5)

    # Ragged / multi-step-grid path (M not a multiple of the tile; no padding pass).
    x_big = jax.random.normal(kx, (3, 701, inp_size), jnp.float32)
    out_big = linear_embedding_sp(x_big, weight, bias)
    jax.block_until_ready(out_big)
    ref_big = x_big @ weight.T + bias
    assert out_big.shape == (3, 701, d_model)
    assert jnp.allclose(out_big, ref_big, atol=1e-5, rtol=1e-5)

    print("KERNEL_OK")
</pallas_src>

<mosaic_0001>
module attributes {stable_mosaic.version = 11 : i64} {
  func.func @_linear_kernel(%arg0: i32, %arg1: memref<16x4xf32, #tpu.memory_space<vmem>>, %arg2: memref<4x32xf32, #tpu.memory_space<vmem>>, %arg3: memref<1x32xf32, #tpu.memory_space<vmem>>, %arg4: memref<16x32xf32, #tpu.memory_space<vmem>>) attributes {dimension_semantics = [#tpu.dimension_semantics<parallel>], iteration_bounds = array<i64: 1>, scalar_prefetch = 0 : i64, scratch_operands = 0 : i64, tpu.core_type = #tpu.core_type<tc>, window_params = [{transform_indices = @transform_0, window_bounds = array<i64: 16, 4>}, {pipeline_mode = #tpu.pipeline_mode<synchronous>, transform_indices = @transform_1, window_bounds = array<i64: 4, 32>}, {pipeline_mode = #tpu.pipeline_mode<synchronous>, transform_indices = @transform_2, window_bounds = array<i64: 1, 32>}, {transform_indices = @transform_3, window_bounds = array<i64: 16, 32>}]} {
    %c0 = arith.constant 0 : index
    %c0_0 = arith.constant 0 : index
    %0 = vector.load %arg1[%c0, %c0_0] : memref<16x4xf32, #tpu.memory_space<vmem>>, vector<16x4xf32>
    %c0_1 = arith.constant 0 : index
    %c0_2 = arith.constant 0 : index
    %1 = vector.load %arg2[%c0_1, %c0_2] : memref<4x32xf32, #tpu.memory_space<vmem>>, vector<4x32xf32>
    %cst = arith.constant dense<0.000000e+00> : vector<16x32xf32>
    %2 = tpu.matmul %0, %1, %cst {dimension_numbers = #tpu.dot_dimension_numbers<[1], [0], [0], [1], [0, 0, 1, 1], [], []>} : vector<16x4xf32>, vector<4x32xf32>, vector<16x32xf32> -> vector<16x32xf32>
    %c0_3 = arith.constant 0 : index
    %c0_4 = arith.constant 0 : index
    %3 = vector.load %arg3[%c0_3, %c0_4] : memref<1x32xf32, #tpu.memory_space<vmem>>, vector<1x32xf32>
    %4 = vector.broadcast %3 : vector<1x32xf32> to vector<16x32xf32>
    %5 = arith.addf %2, %4 : vector<16x32xf32>
    %c0_5 = arith.constant 0 : index
    %c0_6 = arith.constant 0 : index
    %6 = vector.load %arg4[%c0_5, %c0_6] : memref<16x32xf32, #tpu.memory_space<vmem>>, vector<16x32xf32>
    tpu.vector_store %arg4[%c0_5, %c0_6], %5 {strides = array<i32>} : memref<16x32xf32, #tpu.memory_space<vmem>>, vector<16x32xf32>,
    return
  }
  func.func @transform_0(%arg0: i32) -> (i32, i32) {
    %c0_i32 = arith.constant 0 : i32
    %c0_i32_0 = arith.constant 0 : i32
    return %arg0, %c0_i32 : i32, i32
  }
  func.func @transform_1(%arg0: i32) -> (i32, i32) {
    %c0_i32 = arith.constant 0 : i32
    %c0_i32_0 = arith.constant 0 : i32
    %c0_i32_1 = arith.constant 0 : i32
    return %c0_i32, %c0_i32_0 : i32, i32
  }
  func.func @transform_2(%arg0: i32) -> (i32, i32) {
    %c0_i32 = arith.constant 0 : i32
    %c0_i32_0 = arith.constant 0 : i32
    %c0_i32_1 = arith.constant 0 : i32
    return %c0_i32, %c0_i32_0 : i32, i32
  }
  func.func @transform_3(%arg0: i32) -> (i32, i32) {
    %c0_i32 = arith.constant 0 : i32
    %c0_i32_0 = arith.constant 0 : i32
    return %arg0, %c0_i32 : i32, i32
  }
}

</mosaic_0001>

<bundles_post_ra>
// kernel: tpu_custom_call.1
= control target key start
LH: loop header
LB: loop body
LE: loop exit
PB: predicated region body
PF: predicated region fallthrough
CT: control target
= control target key end

     0   :  { %vm29_vm0 = vcmask 1043456   ;;  %vm22_vm1 = vcmask 31744   ;;  %s149_s0 = inlined_call_operand.vmem [shape: f32[16,4], index: 0, kind: input, shape index: {}]   ;;  %s150_s1 = inlined_call_operand.vmem [shape: f32[4,32], index: 1, kind: input, shape index: {}]   ;;  %s151_s2 = inlined_call_operand.vmem [shape: f32[1,32], index: 2, kind: input, shape index: {}]   ;;  %s152_s3 = inlined_call_operand.hbm [shape: f32[16,32], index: 3, kind: output, shape index: {}]  }
   0x1   :  { %v17_v0 = vld [vmem:[%s150_s1] sm:$0xf]  ;;  %v16_v2 = vld [vmem:[%s149_s0 + $0x8] sm:$0xff] }
   0x2   :  { %v15_v1 = vld [vmem:[%s149_s0] sm:$0xff]  ;;  %77 = vmatpush.msk.msra.mxu0 %vm29_vm0, %v17_v0  ;;  %80 = vmatpush.msk.msra.mxu1 %vm29_vm0, %v17_v0 }
   0x3   :  { %8 = vsyncpa [#allocation3], 0  ;;  %78 = vmatmul.msk.f32.vlgmr.msra.gmra.mxu0 %vm22_vm1, %v15_v1  ;;  %79 = vmatmul.msk.f32.vlgmr.msra.gmra.mxu1 %vm22_vm1, %v16_v2  ;;  %v84_v3 = vld [vmem:[%s151_s2] ss:$0 sm:$0xff]  ;;  %s111_s1 = smov [#allocation2]   ;;  %s65_s23 = sshll.u32 %s152_s3, 4  ;;  %s66_s23 = int_to_ptr.hbm [resolvable:$true] %s65_s23 }
   0x4   :  { %s63_s20 = sshll.u32 %s111_s1, 4  ;;  %vm56_vm2 = vcmask 261120   ;;  %s112_s0 = smov 128   ;;  %s64_s20 = int_to_ptr.vmem [resolvable:$true] %s63_s20 }
   0x5   :  { %s113_s24 = smov 8  }
  0x80   :  { %v50_v4 = vpop.f32.mrf.mxu0  ;;  %v53_v5 = vpop.f32.mrf.mxu1 }
  0x81   :  { %v51_v6 = vadd.f32 %v84_v3, %v50_v4  ;;  %v54_v7 = vadd.f32 %v84_v3, %v53_v5 }
  0x83   :  { %57 = vst.msk [vmem:[#allocation2] sm:$0xff] %vm56_vm2, %v51_v6 }
  0x84   :  { %58 = vst.msk [vmem:[#allocation2 + $0x8] sm:$0xff] %vm56_vm2, %v54_v7 }
  0x85   :  { %71 = dma.vmem_to_hbm [thread:$0]  %s64_s20, 256, %s66_s23, [#allocation3], %s112_s0, %s112_s0, %s113_s24  }
  0x86   :  { %109 = dma.done.wait [#allocation3], 256  }
  0x87   :  { %110 = vsyncadd [#allocation3], 4294967040 }
  0x88   :  { %76 = vsyncpa [#allocation3], 1 }

</bundles_post_ra>
